<compile_context>
chip_gen: v5e
topology: v5e:2x2
jax: 0.10.0
libtpu: 0.0.40
codegen_flags: <defaults>
</compile_context>

<pallas_src>
import jax
import jax.numpy as jnp
from jax import lax
from jax.experimental import pallas as pl
from jax.experimental.pallas import tpu as pltpu

IN_DIM, H_DIM, OUT_DIM = 76, 100, 1
PAD = 128            # lane-padded hidden width
T_INDEX = 75
TM_MAX = 2048        # max batch rows per grid step (well inside even v7x's 64 MiB VMEM)


def _round_up(v, m):
    return (v + m - 1) // m * m


def _pick_tm(b, tm_max=TM_MAX):
    """Batch rows per grid step.

    Big tiles amortize the ~600-cycle per-grid-step overhead; keep >=2 grid steps
    when the batch allows so dimension_semantics=('parallel',) can shard the batch
    across the two TensorCores on v7x.
    """
    if b <= 8:
        return b                                   # single (possibly partial) tile
    return min(tm_max, _round_up(pl.cdiv(b, 2), 8))


def _default_act_dtype():
    """bf16 activations/tanh on v6e/v7x (EUP bf16 path); f32 on v5e (no bf16 VPU/EUP)."""
    try:
        kind = jax.devices()[0].device_kind.lower()
    except Exception:
        return jnp.bfloat16
    if "v5 lite" in kind or "v5e" in kind or "v5lite" in kind:
        return jnp.float32
    return jnp.bfloat16


def make_pinn_kernel(act_dtype):
    def pinn_kernel(x_ref, w1_ref, w2_ref, consts_ref, tsel_ref, o_ref):
        # x block: (TM, 76) f32 (lanes padded to 128 by Mosaic; matmul masks them).
        x = x_ref[...]

        b1 = consts_ref[0:1, :]           # (1, 128) f32
        b2 = consts_ref[1:2, :]           # (1, 128) f32
        w3 = consts_ref[2:3, :]           # (1, 128) f32 head weight row
        b3 = consts_ref[3:4, 0:1]         # (1, 1)   f32 head bias

        # Hidden layers: MXU matmuls (bf16 operands, f32 accumulation), tanh on EUP
        # in act_dtype (bf16 on v6e/v7x halves the transcendental cost).
        h1 = jnp.dot(x.astype(jnp.bfloat16), w1_ref[...],
                     preferred_element_type=jnp.float32) + b1
        h1 = jnp.tanh(h1.astype(act_dtype))
        h2 = jnp.dot(h1.astype(jnp.bfloat16), w2_ref[...],
                     preferred_element_type=jnp.float32) + b2
        h2 = jnp.tanh(h2.astype(act_dtype))

        # Head Linear(100,1) as a lane-dense (1, TM) row on the MXU:
        #   y[0, m] = sum_k w3[0, k] * h2[m, k]
        y = lax.dot_general(w3.astype(h2.dtype), h2,
                            (((1,), (1,)), ((), ())),
                            preferred_element_type=jnp.float32) + b3

        # t = x[:, 75] as a lane-dense (1, TM) row via an exact f32 one-hot dot.
        t = lax.dot_general(tsel_ref[...], x,
                            (((1,), (1,)), ((), ())),
                            preferred_element_type=jnp.float32)

        # 0.5 + 0.5*t + t*y  ==  0.5 + t*(0.5 + y)
        out_row = 0.5 + t * (0.5 + y)                       # (1, TM) f32
        o_ref[...] = out_row.reshape(o_ref.shape)           # (1, 1, TM)

    return pinn_kernel


def prepare_params(params):
    """One-time: transpose to (in,out), zero-pad hidden dim to 128 lanes, bf16 matmul
    weights, and coalesce b1/b2/w3/b3 into one (8,128) f32 constant slab."""
    (w1, b1), (w2, b2), (w3, b3) = params
    w1_p = jnp.zeros((IN_DIM, PAD), jnp.bfloat16).at[:, :H_DIM].set(
        w1.T.astype(jnp.bfloat16))                          # (76,128) bf16
    w2_p = jnp.zeros((PAD, PAD), jnp.bfloat16).at[:H_DIM, :H_DIM].set(
        w2.T.astype(jnp.bfloat16))                          # (128,128) bf16
    consts = jnp.zeros((8, PAD), jnp.float32)
    consts = consts.at[0, :H_DIM].set(b1.astype(jnp.float32))       # b1
    consts = consts.at[1, :H_DIM].set(b2.astype(jnp.float32))       # b2
    consts = consts.at[2, :H_DIM].set(w3[0].astype(jnp.float32))    # head weight row
    consts = consts.at[3, 0].set(b3[0].astype(jnp.float32))         # head bias
    tsel = jnp.zeros((1, IN_DIM), jnp.float32).at[0, T_INDEX].set(1.0)  # t selector
    return (w1_p, w2_p, consts, tsel)


def pinn_forward(x, prepared, *, tm=None, act_dtype=None):
    """x: (76,) -> (1,)  (matches the PyTorch forward), or (B,76) -> (B,1) batched."""
    w1_p, w2_p, consts, tsel = prepared
    single = (x.ndim == 1)
    if single:
        x = x[None, :]
    x = x.astype(jnp.float32)
    b = x.shape[0]
    if tm is None:
        tm = _pick_tm(b)
    if act_dtype is None:
        act_dtype = _default_act_dtype()
    num_tiles = pl.cdiv(b, tm)

    const = lambda i: (0, 0)   # weights: same block every step -> DMA once, VMEM-resident
    out = pl.pallas_call(
        make_pinn_kernel(act_dtype),
        out_shape=jax.ShapeDtypeStruct((num_tiles, 1, tm), jnp.float32),
        grid_spec=pltpu.PrefetchScalarGridSpec(
            num_scalar_prefetch=0,
            grid=(num_tiles,),
            in_specs=[
                pl.BlockSpec((tm, IN_DIM), lambda i: (i, 0)),   # x tile (unpadded lanes)
                pl.BlockSpec((IN_DIM, PAD), const),             # w1 (bf16)
                pl.BlockSpec((PAD, PAD), const),                # w2 (bf16)
                pl.BlockSpec((8, PAD), const),                  # b1/b2/w3/b3 slab (f32)
                pl.BlockSpec((1, IN_DIM), const),               # one-hot t selector
            ],
            out_specs=pl.BlockSpec((1, 1, tm), lambda i: (i, 0, 0)),  # lane-dense row
        ),
        compiler_params=pltpu.CompilerParams(
            dimension_semantics=("parallel",),        # shard batch across TCs (v7x)
            vmem_limit_bytes=32 * 1024 * 1024),       # cover v5e's 16 MiB default limit
    )(x, w1_p, w2_p, consts, tsel)

    out = out.reshape(-1)[:b, None]                   # (B, 1); drop ragged-tail garbage
    return out[0] if single else out


def init_params(key):
    """Deterministic PyTorch-default-style init: U(-1/sqrt(fan_in), 1/sqrt(fan_in))."""
    def linear(key, fan_in, fan_out):
        kw, kb = jax.random.split(key)
        bound = 1.0 / jnp.sqrt(fan_in)
        w = jax.random.uniform(kw, (fan_out, fan_in), jnp.float32, -bound, bound)
        b = jax.random.uniform(kb, (fan_out,), jnp.float32, -bound, bound)
        return w, b

    k1, k2, k3 = jax.random.split(key, 3)
    return (linear(k1, IN_DIM, H_DIM), linear(k2, H_DIM, H_DIM), linear(k3, H_DIM, OUT_DIM))


def reference_forward(x, params):
    """Pure-JAX f32 reference mirroring the PyTorch module exactly (single (76,) vector)."""
    (w1, b1), (w2, b2), (w3, b3) = params
    t = x[T_INDEX]
    h = jnp.tanh(x @ w1.T + b1)
    h = jnp.tanh(h @ w2.T + b2)
    y = h @ w3.T + b3
    return 0.5 + 0.5 * t + t * y


if __name__ == "__main__":
    key = jax.random.PRNGKey(0)
    kx, kp = jax.random.split(key)

    params = init_params(kp)
    prepared = prepare_params(params)          # one-time pad / transpose / bf16 / coalesce

    # Batched collocation points (the realistic PINN workload), kept small for the demo.
    B = 256
    xb = jax.random.uniform(kx, (B, IN_DIM), jnp.float32)

    fwd = jax.jit(pinn_forward)
    out_b = jax.block_until_ready(fwd(xb, prepared))
    ref_b = jax.vmap(lambda v: reference_forward(v, params))(xb)
    assert out_b.shape == (B, 1), out_b.shape
    # bf16 weights + bf16 tanh -> ~1e-3-level differences vs the full-f32 reference.
    assert jnp.allclose(out_b, ref_b, atol=2e-2, rtol=2e-2), \
        float(jnp.max(jnp.abs(out_b - ref_b)))

    # Ragged batch (exercises the partial last tile / edge-block masking path).
    Br = 100
    xr = jax.random.uniform(kx, (Br, IN_DIM), jnp.float32)
    out_r = jax.block_until_ready(pinn_forward(xr, prepared))
    ref_r = jax.vmap(lambda v: reference_forward(v, params))(xr)
    assert out_r.shape == (Br, 1), out_r.shape
    assert jnp.allclose(out_r, ref_r, atol=2e-2, rtol=2e-2), \
        float(jnp.max(jnp.abs(out_r - ref_r)))

    # Single-vector semantics, exactly like the PyTorch forward(x: (76,)) -> (1,).
    x1 = xb[0]
    out_1 = jax.block_until_ready(pinn_forward(x1, prepared))
    ref_1 = reference_forward(x1, params)
    assert out_1.shape == (1,), out_1.shape
    assert jnp.allclose(out_1, ref_1, atol=2e-2, rtol=2e-2), (out_1, ref_1)

    print("KERNEL_OK")
</pallas_src>

<mosaic_0001>
module attributes {stable_mosaic.version = 11 : i64} {
  func.func @pinn_kernel(%arg0: i32, %arg1: memref<128x76xf32, #tpu.memory_space<vmem>>, %arg2: memref<76x128xbf16, #tpu.memory_space<vmem>>, %arg3: memref<128x128xbf16, #tpu.memory_space<vmem>>, %arg4: memref<8x128xf32, #tpu.memory_space<vmem>>, %arg5: memref<1x76xf32, #tpu.memory_space<vmem>>, %arg6: memref<1x1x128xf32, #tpu.memory_space<vmem>>) attributes {dimension_semantics = [#tpu.dimension_semantics<parallel>], iteration_bounds = array<i64: 2>, scalar_prefetch = 0 : i64, scratch_operands = 0 : i64, tpu.core_type = #tpu.core_type<tc>, window_params = [{transform_indices = @transform_0, window_bounds = array<i64: 128, 76>}, {pipeline_mode = #tpu.pipeline_mode<synchronous>, transform_indices = @transform_1, window_bounds = array<i64: 76, 128>}, {pipeline_mode = #tpu.pipeline_mode<synchronous>, transform_indices = @transform_2, window_bounds = array<i64: 128, 128>}, {pipeline_mode = #tpu.pipeline_mode<synchronous>, transform_indices = @transform_3, window_bounds = array<i64: 8, 128>}, {pipeline_mode = #tpu.pipeline_mode<synchronous>, transform_indices = @transform_4, window_bounds = array<i64: 1, 76>}, {transform_indices = @transform_5, window_bounds = array<i64: 1, 1, 128>}]} {
    %c0 = arith.constant 0 : index
    %c0_0 = arith.constant 0 : index
    %0 = vector.load %arg1[%c0, %c0_0] : memref<128x76xf32, #tpu.memory_space<vmem>>, vector<128x76xf32>
    %c0_1 = arith.constant 0 : index
    %c0_2 = arith.constant 0 : index
    %1 = vector.load %arg4[%c0_1, %c0_2] : memref<8x128xf32, #tpu.memory_space<vmem>>, vector<1x128xf32>
    %c1 = arith.constant 1 : index
    %c0_3 = arith.constant 0 : index
    %2 = vector.load %arg4[%c1, %c0_3] : memref<8x128xf32, #tpu.memory_space<vmem>>, vector<1x128xf32>
    %c2 = arith.constant 2 : index
    %c0_4 = arith.constant 0 : index
    %3 = vector.load %arg4[%c2, %c0_4] : memref<8x128xf32, #tpu.memory_space<vmem>>, vector<1x128xf32>
    %c3 = arith.constant 3 : index
    %c0_5 = arith.constant 0 : index
    %4 = vector.load %arg4[%c3, %c0_5] : memref<8x128xf32, #tpu.memory_space<vmem>>, vector<1x1xf32>
    %5 = arith.truncf %0 : vector<128x76xf32> to vector<128x76xbf16>
    %c0_6 = arith.constant 0 : index
    %c0_7 = arith.constant 0 : index
    %6 = vector.load %arg2[%c0_6, %c0_7] : memref<76x128xbf16, #tpu.memory_space<vmem>>, vector<76x128xbf16>
    %cst = arith.constant dense<0.000000e+00> : vector<128x128xf32>
    %7 = tpu.matmul %5, %6, %cst {dimension_numbers = #tpu.dot_dimension_numbers<[1], [0], [0], [1], [0, 0, 1, 1], [], []>} : vector<128x76xbf16>, vector<76x128xbf16>, vector<128x128xf32> -> vector<128x128xf32>
    %8 = vector.broadcast %1 : vector<1x128xf32> to vector<128x128xf32>
    %9 = arith.addf %7, %8 : vector<128x128xf32>
    %10 = arith.truncf %9 : vector<128x128xf32> to vector<128x128xbf16>
    %11 = math.tanh %10 : vector<128x128xbf16>
    %c0_8 = arith.constant 0 : index
    %c0_9 = arith.constant 0 : index
    %12 = vector.load %arg3[%c0_8, %c0_9] : memref<128x128xbf16, #tpu.memory_space<vmem>>, vector<128x128xbf16>
    %cst_10 = arith.constant dense<0.000000e+00> : vector<128x128xf32>
    %13 = tpu.matmul %11, %12, %cst_10 {dimension_numbers = #tpu.dot_dimension_numbers<[1], [0], [0], [1], [0, 0, 1, 1], [], []>} : vector<128x128xbf16>, vector<128x128xbf16>, vector<128x128xf32> -> vector<128x128xf32>
    %14 = vector.broadcast %2 : vector<1x128xf32> to vector<128x128xf32>
    %15 = arith.addf %13, %14 : vector<128x128xf32>
    %16 = arith.truncf %15 : vector<128x128xf32> to vector<128x128xbf16>
    %17 = math.tanh %16 : vector<128x128xbf16>
    %18 = arith.truncf %3 : vector<1x128xf32> to vector<1x128xbf16>
    %cst_11 = arith.constant dense<0.000000e+00> : vector<1x128xf32>
    %19 = tpu.matmul %18, %17, %cst_11 {dimension_numbers = #tpu.dot_dimension_numbers<[1], [1], [0], [0], [0, 0, 1, 0], [], []>} : vector<1x128xbf16>, vector<128x128xbf16>, vector<1x128xf32> -> vector<1x128xf32>
    %20 = vector.broadcast %4 : vector<1x1xf32> to vector<1x128xf32>
    %21 = arith.addf %19, %20 : vector<1x128xf32>
    %c0_12 = arith.constant 0 : index
    %c0_13 = arith.constant 0 : index
    %22 = vector.load %arg5[%c0_12, %c0_13] : memref<1x76xf32, #tpu.memory_space<vmem>>, vector<1x76xf32>
    %cst_14 = arith.constant dense<0.000000e+00> : vector<1x128xf32>
    %23 = tpu.matmul %22, %0, %cst_14 {dimension_numbers = #tpu.dot_dimension_numbers<[1], [1], [0], [0], [0, 0, 1, 0], [], []>} : vector<1x76xf32>, vector<128x76xf32>, vector<1x128xf32> -> vector<1x128xf32>
    %cst_15 = arith.constant 5.000000e-01 : f32
    %24 = vector.broadcast %cst_15 : f32 to vector<1x128xf32>
    %25 = arith.addf %24, %21 : vector<1x128xf32>
    %26 = arith.mulf %23, %25 : vector<1x128xf32>
    %cst_16 = arith.constant 5.000000e-01 : f32
    %27 = vector.broadcast %cst_16 : f32 to vector<1x128xf32>
    %28 = arith.addf %27, %26 : vector<1x128xf32>
    %29 = vector.shape_cast %28 : vector<1x128xf32> to vector<1x1x128xf32>
    %c0_17 = arith.constant 0 : index
    %c0_18 = arith.constant 0 : index
    %c0_19 = arith.constant 0 : index
    %30 = vector.load %arg6[%c0_17, %c0_18, %c0_19] : memref<1x1x128xf32, #tpu.memory_space<vmem>>, vector<1x1x128xf32>
    tpu.vector_store %arg6[%c0_17, %c0_18, %c0_19], %29 {strides = array<i32>} : memref<1x1x128xf32, #tpu.memory_space<vmem>>, vector<1x1x128xf32>,
    return
  }
  func.func @transform_0(%arg0: i32) -> (i32, i32) {
    %c0_i32 = arith.constant 0 : i32
    %c0_i32_0 = arith.constant 0 : i32
    return %arg0, %c0_i32 : i32, i32
  }
  func.func @transform_1(%arg0: i32) -> (i32, i32) {
    %c0_i32 = arith.constant 0 : i32
    %c0_i32_0 = arith.constant 0 : i32
    %c0_i32_1 = arith.constant 0 : i32
    return %c0_i32, %c0_i32_0 : i32, i32
  }
  func.func @transform_2(%arg0: i32) -> (i32, i32) {
    %c0_i32 = arith.constant 0 : i32
    %c0_i32_0 = arith.constant 0 : i32
    %c0_i32_1 = arith.constant 0 : i32
    return %c0_i32, %c0_i32_0 : i32, i32
  }
  func.func @transform_3(%arg0: i32) -> (i32, i32) {
    %c0_i32 = arith.constant 0 : i32
    %c0_i32_0 = arith.constant 0 : i32
    %c0_i32_1 = arith.constant 0 : i32
    return %c0_i32, %c0_i32_0 : i32, i32
  }
  func.func @transform_4(%arg0: i32) -> (i32, i32) {
    %c0_i32 = arith.constant 0 : i32
    %c0_i32_0 = arith.constant 0 : i32
    %c0_i32_1 = arith.constant 0 : i32
    return %c0_i32, %c0_i32_0 : i32, i32
  }
  func.func @transform_5(%arg0: i32) -> (i32, i32, i32) {
    %c0_i32 = arith.constant 0 : i32
    %c0_i32_0 = arith.constant 0 : i32
    %c0_i32_1 = arith.constant 0 : i32
    return %arg0, %c0_i32, %c0_i32_0 : i32, i32, i32
  }
}

</mosaic_0001>

<bundles_post_ra>
// kernel: pinn_forward.1
= control target key start
LH: loop header
LB: loop body
LE: loop exit
PB: predicated region body
PF: predicated region fallthrough
CT: control target
= control target key end

     0   :  { %10 = vsyncpa [#allocation3], 0  ;;  %s1311_s0 = inlined_call_operand.vmem [shape: f32[256,76], index: 0, kind: input, shape index: {}]   ;;  %s1312_s1 = inlined_call_operand.vmem [shape: bf16[76,128], index: 1, kind: input, shape index: {}]   ;;  %s1313_s2 = inlined_call_operand.vmem [shape: bf16[128,128], index: 2, kind: input, shape index: {}]   ;;  %s1314_s3 = inlined_call_operand.vmem [shape: f32[8,128], index: 3, kind: input, shape index: {}]   ;;  %s1315_s4 = inlined_call_operand.vmem [shape: f32[1,76], index: 4, kind: input, shape index: {}]   ;;  %s1316_s5 = inlined_call_operand.hbm [shape: f32[2,1,128], index: 5, kind: output, shape index: {}]  }
   0x1   :  { %12 = vsyncpa [#allocation3 + $0x1], 0  ;;  %s1052_s18 = smov 0   ;;  %s1054_s19 = smov 0  }
   0x2   :  { %s1056_s20 = smov 0   ;;  %s1058_s21 = smov 0  }
   0x3 LB: > { %s1073_s22 = sadd.s32 4294967295, %s1019_s21   ;;  %s744_s23 = sadd.s32 4294967294, %s1019_s21   ;;  %s1019_s21 = sphi %s1058_s21, %s1322_s21   ;;  %s1015_s20 = sphi %s1056_s20, %s1321_s20   ;;  %s1011_s19 = sphi %s1054_s19, %s1320_s19   ;;  %s1007_s18 = sphi %s1052_s18, %s1319_s18  }
   0x4   : > { %s1077_s24 = sadd.s32 1, %s1019_s21   ;;  %s135_s25 = sadd.s32 1, %s1015_s20 }
   0x5   : > { %s132_s26 = ssub.s32 %s1019_s21, %s1077_s24  ;;  %p145_p0 = scmp.ne.s32.totalorder %s1015_s20, %s1011_s19 }
   0x6   : > { %p133_p1 = scmp.eq.s32.totalorder %s132_s26, 0  ;;  %p146_p2 = scmp.eq.s32.totalorder %s1073_s22, 1 }
   0x7   : > { %p151_p3 = scmp.ne.s32.totalorder %s1011_s19, %s1007_s18  ;;  %p152_p4 = scmp.eq.s32.totalorder %s744_s23, 1 }
   0x8   : > { %s1088_s27 = scalar_select %p133_p1, %s1015_s20, %s135_s25  }
   0x9   : > { %p1090_p5 = por %p146_p2, %p145_p0  ;;  %p1094_p6 = por %p152_p4, %p151_p3 }
   0xa   : > { %p747_p7 = scmp.ge.s32.totalorder %s1019_s21, 1  ;;  %p191_p8 = scmp.lt.s32.totalorder %s1019_s21, 3 }
   0xc   : > { %p192_p9 = pnand %p747_p7, %p191_p8 }
   0xd   : > { %s748_s9 = sshll.u32 (!%p192_p9), %s1073_s22, 4  ;;  %s216_s16 = sand.u32 (!%p192_p9), 1, %s1011_s19  }
   0xe   : > { %195 = sbr.rel (%p192_p9) target bundleno = 666 (0x29a), region = 40  ;;  %p219_p10 = scmp.lt.s32.totalorder (!%p192_p9), %s748_s9, 31 }
   0xf   : > { %s685_s26 = scalar_lea.hbm (!%p192_p9), %s1316_s5, %s1073_s22  ;;  %s217_s30 = scalar_lea.vmem (!%p192_p9), [#allocation2], %s216_s16 }
  0x10   : > { %s687_s6 = sshll.u32 (!%p192_p9), %s217_s30, 4  ;;  %s677_s7 = scalar_lea.sflag (!%p192_p9), [#allocation3], %s216_s16  ;;  %s688_s6 = int_to_ptr.vmem [resolvable:$true] %s687_s6 }
  0x11   : > { %s977_s11 = scalar_lea.hbm (!%p192_p9), %s1316_s5, 2 }
  0x13   : > { %v768_v0 = vld [vmem:[%s1312_s1 + $0x20] sm:$0xf]  ;;  %v833_v1 = vld [vmem:[%s1312_s1 + $0x20] sm:$0x30]  ;;  %vm318_vm0 = vcmask 1045504   ;;  %v832_v4 = vld [vmem:[%s1312_s1 + $0x18] sm:$0xff] }
  0x14   : > { %v769_v2 = vor.u32 %v833_v1, %v768_v0  ;;  %s1324_s9 = smov (!%p219_p10, %s748_s9), 31  ;;  %v831_v5 = vld [vmem:[%s1312_s1 + $0x10] sm:$0xff]  ;;  %v830_v6 = vld [vmem:[%s1312_s1 + $0x8] sm:$0xff]  ;;  %v829_v7 = vld [vmem:[%s1312_s1] sm:$0xff]  ;;  %vm293_vm1 = vcmask 621568  }
  0x15   : > { %s749_s14 = sshll.u32 %s1324_s9, 3  ;;  %v841_v26 = vld [vmem:[%s1313_s2 + $0x38] sm:$0xff]  ;;  %v840_v27 = vld [vmem:[%s1313_s2 + $0x30] sm:$0xff]  ;;  %v839_v31 = vld [vmem:[%s1313_s2 + $0x28] sm:$0xff] }
  0x16   : > { %v320_v3 = vsel %vm318_vm0, %v769_v2, 0  ;;  %s1119_s25 = scalar_lea.vmem %s1311_s0, %s749_s14  ;;  %484 = vmatpush.bf16.msra.mxu1 %v841_v26  ;;  %842 = vmatpush.bf16.msra.mxu3 %v841_v26  ;;  %v838_v32 = vld [vmem:[%s1313_s2 + $0x20] sm:$0xff]  ;;  %v837_v33 = vld [vmem:[%s1313_s2 + $0x18] sm:$0xff]  ;;  %v836_v36 = vld [vmem:[%s1313_s2 + $0x10] sm:$0xff] }
  0x17   : > { %325 = vmatpush.bf16.msra.mxu0 %v320_v3  ;;  %v1125_v8 = vld [vmem:[%s1119_s25] sm:$0xff]  ;;  %v1128_v9 = vld [vmem:[%s1119_s25 + $0x8] sm:$0xff]  ;;  %v1134_v11 = vld [vmem:[%s1119_s25 + $0x10] sm:$0xff] }
  0x18   : > { %v245_v10 = vpack.c.bf16 %v1128_v9, %v1125_v8  ;;  %v1137_v12 = vld [vmem:[%s1119_s25 + $0x18] sm:$0xff]  ;;  %v1143_v14 = vld [vmem:[%s1119_s25 + $0x20] sm:$0xff]  ;;  %v1146_v15 = vld [vmem:[%s1119_s25 + $0x28] sm:$0xff] }
  0x19   : > { %v246_v13 = vpack.c.bf16 %v1137_v12, %v1134_v11  ;;  %v247_v16 = vpack.c.bf16 %v1146_v15, %v1143_v14  ;;  %v1152_v17 = vld [vmem:[%s1119_s25 + $0x30] sm:$0xff]  ;;  %v1155_v18 = vld [vmem:[%s1119_s25 + $0x38] sm:$0xff]  ;;  %v233_v20 = vld [vmem:[%s1119_s25 + $0x40] sm:$0xff] }
  0x1a   : > { %v248_v19 = vpack.c.bf16 %v1155_v18, %v1152_v17  ;;  %v234_v21 = vld [vmem:[%s1119_s25 + $0x48] sm:$0xff]  ;;  %v235_v23 = vld [vmem:[%s1119_s25 + $0x50] sm:$0xff]  ;;  %v236_v24 = vld [vmem:[%s1119_s25 + $0x58] sm:$0xff]  ;;  %485 = vmatpush.bf16.msra.mxu1 %v840_v27  ;;  %843 = vmatpush.bf16.msra.mxu3 %v840_v27 }
  0x1b   : > { %326 = vmatpush.bf16.msra.mxu0 %v832_v4  ;;  %v249_v22 = vpack.c.bf16 %v234_v21, %v233_v20  ;;  %v250_v25 = vpack.c.bf16 %v236_v24, %v235_v23  ;;  %v237_v28 = vld [vmem:[%s1119_s25 + $0x60] sm:$0xff]  ;;  %v238_v29 = vld [vmem:[%s1119_s25 + $0x68] sm:$0xff]  ;;  %v239_v34 = vld [vmem:[%s1119_s25 + $0x70] sm:$0xff] }
  0x1c   : > { %v251_v30 = vpack.c.bf16 %v238_v29, %v237_v28  ;;  %v240_v35 = vld [vmem:[%s1119_s25 + $0x78] sm:$0xff]  ;;  %v835_v38 = vld [vmem:[%s1313_s2 + $0x8] sm:$0xff]  ;;  %v834_v39 = vld [vmem:[%s1313_s2] sm:$0xff]  ;;  %s689_s25 = sshll.u32 %s685_s26, 4  ;;  %s690_s25 = int_to_ptr.hbm [resolvable:$true] %s689_s25 }
  0x1d   : > { %v252_v37 = vpack.c.bf16 %v240_v35, %v239_v34  ;;  %v1203_v41 = vld [vmem:[%s1314_s3] ss:$0 sm:$0xff]  ;;  %s971_s8 = sshra.s32 %s690_s25, 4  ;;  %s972_s8 = int_to_ptr.hbm [resolvable:$true] %s971_s8 }
  0x1e   : > { %486 = vmatpush.bf16.msra.mxu1 %v839_v31  ;;  %844 = vmatpush.bf16.msra.mxu3 %v839_v31  ;;  %s973_s9 = scalar_lea.hbm %s972_s8, 1  ;;  %p978_p0 = scmp.lt.s32.totalorder %s972_s8, %s1316_s5 }
  0x1f   : > { %327 = vmatpush.bf16.msra.mxu0 %v831_v5  ;;  %p974_p11 = scmp.ne.s32.totalorder %s972_s8, %s973_s9  ;;  %p979_p1 = scmp.lt.s32.totalorder %s977_s11, %s973_s9 }
  0x21   : > { %p975_p12 = pnand %p974_p11, %p1090_p5  ;;  %p980_p2 = por %p979_p1, %p978_p0 }
  0x22   : > { %487 = vmatpush.bf16.msra.mxu1 %v838_v32  ;;  %845 = vmatpush.bf16.msra.mxu3 %v838_v32 }
  0x23   : > { %328 = vmatpush.bf16.msra.mxu0 %v830_v6  ;;  %p976_p13 = pneg %p975_p12 }
  0x25   : > { %p981_p3 = pnand %p980_p2, %p976_p13 }
  0x26   : > { %488 = vmatpush.bf16.msra.mxu1 %v837_v33  ;;  %846 = vmatpush.bf16.msra.mxu3 %v837_v33 }
  0x27   : > { %329 = vmatpush.bf16.msra.mxu0 %v829_v7 }
  0x2a   : > { %770 = vmatmul.msk.bf16.vlgmr.msra.gmra.mxu0 %vm293_vm1, %v245_v10  ;;  %489 = vmatpush.bf16.msra.mxu1 %v836_v36 }
  0x2b   : > { %847 = vmatpush.bf16.msra.mxu3 %v836_v36 }
  0x2e   : > { %490 = vmatpush.bf16.msra.mxu1 %v835_v38 }
  0x2f   : > { %848 = vmatpush.bf16.msra.mxu3 %v835_v38 }
  0x32   : > { %491 = vmatpush.bf16.msra.mxu1 %v834_v39 }
  0x33   : > { %849 = vmatpush.bf16.msra.mxu3 %v834_v39 }
  0x37   : > { %810 = vmatpush.xpose.msk.msrb.mxu3 %vm293_vm1, %v240_v35 }
  0x3a   : > { %771 = vmatmul.msk.bf16.gmra.mxu0 %vm293_vm1, %v246_v13 }
  0x3b   : > { %811 = vmatpush.xpose.msk.msrb.mxu3 %vm293_vm1, %v239_v34 }
  0x3f   : > { %812 = vmatpush.xpose.msk.msrb.mxu3 %vm293_vm1, %v238_v29 }
  0x43   : > { %813 = vmatpush.xpose.msk.msrb.mxu3 %vm293_vm1, %v237_v28 }
  0x47   : > { %814 = vmatpush.xpose.msk.msrb.mxu3 %vm293_vm1, %v236_v24 }
  0x4a   : > { %772 = vmatmul.msk.bf16.gmra.mxu0 %vm293_vm1, %v247_v16 }
  0x4b   : > { %815 = vmatpush.xpose.msk.msrb.mxu3 %vm293_vm1, %v235_v23 }
  0x4f   : > { %816 = vmatpush.xpose.msk.msrb.mxu3 %vm293_vm1, %v234_v21 }
  0x53   : > { %817 = vmatpush.xpose.msk.msrb.mxu3 %vm293_vm1, %v233_v20 }
  0x57   : > { %818 = vmatpush.xpose.msk.msrb.mxu3 %vm293_vm1, %v1155_v18 }
  0x5a   : > { %773 = vmatmul.msk.bf16.gmra.mxu0 %vm293_vm1, %v248_v19 }
  0x5b   : > { %819 = vmatpush.xpose.msk.msrb.mxu3 %vm293_vm1, %v1152_v17 }
  0x5f   : > { %820 = vmatpush.xpose.msk.msrb.mxu3 %vm293_vm1, %v1146_v15 }
  0x63   : > { %821 = vmatpush.xpose.msk.msrb.mxu3 %vm293_vm1, %v1143_v14 }
  0x67   : > { %822 = vmatpush.xpose.msk.msrb.mxu3 %vm293_vm1, %v1137_v12 }
  0x6a   : > { %774 = vmatmul.msk.bf16.gmra.mxu0 %vm293_vm1, %v249_v22 }
  0x6b   : > { %823 = vmatpush.xpose.msk.msrb.mxu3 %vm293_vm1, %v1134_v11 }
  0x6f   : > { %824 = vmatpush.xpose.msk.msrb.mxu3 %vm293_vm1, %v1128_v9 }
  0x73   : > { %825 = vmatpush.xpose.msk.msrb.mxu3 %vm293_vm1, %v1125_v8 }
  0x7a   : > { %775 = vmatmul.msk.bf16.gmra.mxu0 %vm293_vm1, %v250_v25 }
  0x8a   : > { %776 = vmatmul.msk.bf16.gmra.mxu0 %vm293_vm1, %v251_v30 }
  0x9a   : > { %777 = vmatmul.msk.bf16.gmra.mxu0 %vm293_vm1, %v252_v37 }
  0xa7   : > { %v331_v40 = vpop.f32.mrf.mxu0 }
  0xa8   : > { %v332_v43 = vadd.f32 %v1203_v41, %v331_v40 }
  0xaf   : > { %v333_v42 = vpop.f32.mrf.mxu0 }
  0xb0   : > { %v334_v44 = vadd.f32 %v1203_v41, %v333_v42 }
  0xb2   : > { %v371_v45 = vpack.c.bf16 %v334_v44, %v332_v43 }
  0xb4   : > { %v379_v46 = vunpack.c.l.bf16 %v371_v45  ;;  %v380_v47 = vunpack.c.h.bf16 %v371_v45 }
  0xb6   : > { %893 = vtanh.f32 %v379_v46 }
  0xb7   : > { %895 = vtanh.f32 %v380_v47  ;;  %v336_v48 = vpop.f32.mrf.mxu0 }
  0xb8   : > { %v337_v53 = vadd.f32 %v1203_v41, %v336_v48 }
  0xbc   : > { %v894_v49 = vpop.eup %893 }
  0xbd   : > { %v896_v50 = vpop.eup %895 }
  0xbe   : > { %v411_v51 = vpack.c.bf16 %v896_v50, %v894_v49 }
  0xbf   : > { %v338_v52 = vpop.f32.mrf.mxu0 }
  0xc0   : > { %v339_v54 = vadd.f32 %v1203_v41, %v338_v52  ;;  %492 = vmatmul.bf16.vlgmr.msra.gmra.mxu1 %v411_v51 }
  0xc2   : > { %v372_v55 = vpack.c.bf16 %v339_v54, %v337_v53 }
  0xc4   : > { %v381_v56 = vunpack.c.l.bf16 %v372_v55  ;;  %v382_v57 = vunpack.c.h.bf16 %v372_v55 }
  0xc6   : > { %897 = vtanh.f32 %v381_v56 }
  0xc7   : > { %899 = vtanh.f32 %v382_v57  ;;  %v341_v58 = vpop.f32.mrf.mxu0 }
  0xc8   : > { %v342_v63 = vadd.f32 %v1203_v41, %v341_v58 }
  0xcc   : > { %v898_v59 = vpop.eup %897 }
  0xcd   : > { %v900_v60 = vpop.eup %899 }
  0xce   : > { %v412_v61 = vpack.c.bf16 %v900_v60, %v898_v59  ;;  %v1244_v59 = vld [vmem:[%s1314_s3 + $0x1] ss:$0 sm:$0xff] }
  0xcf   : > { %v343_v62 = vpop.f32.mrf.mxu0 }
  0xd0   : > { %v344_v0 = vadd.f32 %v1203_v41, %v343_v62  ;;  %497 = vmatmul.bf16.gmra.mxu1 %v412_v61 }
  0xd2   : > { %v373_v1 = vpack.c.bf16 %v344_v0, %v342_v63 }
  0xd4   : > { %v383_v2 = vunpack.c.l.bf16 %v373_v1  ;;  %v384_v3 = vunpack.c.h.bf16 %v373_v1 }
  0xd6   : > { %901 = vtanh.f32 %v383_v2 }
  0xd7   : > { %903 = vtanh.f32 %v384_v3  ;;  %v346_v4 = vpop.f32.mrf.mxu0 }
  0xd8   : > { %v347_v12 = vadd.f32 %v1203_v41, %v346_v4 }
  0xdc   : > { %v902_v5 = vpop.eup %901 }
  0xdd   : > { %v904_v6 = vpop.eup %903 }
  0xde   : > { %v413_v7 = vpack.c.bf16 %v904_v6, %v902_v5 }
  0xdf   : > { %v348_v10 = vpop.f32.mrf.mxu0 }
  0xe0   : > { %v349_v13 = vadd.f32 %v1203_v41, %v348_v10  ;;  %502 = vmatmul.bf16.gmra.mxu1 %v413_v7 }
  0xe2   : > { %v374_v11 = vpack.c.bf16 %v349_v13, %v347_v12 }
  0xe4   : > { %v385_v14 = vunpack.c.l.bf16 %v374_v11  ;;  %v386_v15 = vunpack.c.h.bf16 %v374_v11 }
  0xe6   : > { %905 = vtanh.f32 %v385_v14 }
  0xe7   : > { %907 = vtanh.f32 %v386_v15  ;;  %v351_v9 = vpop.f32.mrf.mxu0 }
  0xe8   : > { %v352_v8 = vadd.f32 %v1203_v41, %v351_v9 }
  0xec   : > { %v906_v16 = vpop.eup %905 }
  0xed   : > { %v908_v17 = vpop.eup %907 }
  0xee   : > { %v414_v18 = vpack.c.bf16 %v908_v17, %v906_v16 }
  0xef   : > { %v353_v19 = vpop.f32.mrf.mxu0 }
  0xf0   : > { %v354_v20 = vadd.f32 %v1203_v41, %v353_v19  ;;  %507 = vmatmul.bf16.gmra.mxu1 %v414_v18 }
  0xf2   : > { %v375_v21 = vpack.c.bf16 %v354_v20, %v352_v8 }
  0xf4   : > { %v387_v22 = vunpack.c.l.bf16 %v375_v21  ;;  %v388_v23 = vunpack.c.h.bf16 %v375_v21 }
  0xf6   : > { %909 = vtanh.f32 %v387_v22 }
  0xf7   : > { %911 = vtanh.f32 %v388_v23  ;;  %v356_v24 = vpop.f32.mrf.mxu0 }
  0xf8   : > { %v357_v29 = vadd.f32 %v1203_v41, %v356_v24 }
  0xfc   : > { %v910_v25 = vpop.eup %909 }
  0xfd   : > { %v912_v26 = vpop.eup %911 }
  0xfe   : > { %v415_v27 = vpack.c.bf16 %v912_v26, %v910_v25 }
  0xff   : > { %v358_v28 = vpop.f32.mrf.mxu0 }
 0x100   : > { %v359_v30 = vadd.f32 %v1203_v41, %v358_v28  ;;  %512 = vmatmul.bf16.vlgmr.msra.gmra.mxu3 %v415_v27 }
 0x102   : > { %v376_v31 = vpack.c.bf16 %v359_v30, %v357_v29 }
 0x104   : > { %v389_v32 = vunpack.c.l.bf16 %v376_v31  ;;  %v390_v33 = vunpack.c.h.bf16 %v376_v31 }
 0x106   : > { %913 = vtanh.f32 %v389_v32 }
 0x107   : > { %915 = vtanh.f32 %v390_v33  ;;  %v361_v34 = vpop.f32.mrf.mxu0 }
 0x108   : > { %v362_v39 = vadd.f32 %v1203_v41, %v361_v34 }
 0x10c   : > { %v914_v35 = vpop.eup %913 }
 0x10d   : > { %v916_v36 = vpop.eup %915 }
 0x10e   : > { %v416_v37 = vpack.c.bf16 %v916_v36, %v914_v35 }
 0x10f   : > { %v363_v38 = vpop.f32.mrf.mxu0 }
 0x110   : > { %v364_v40 = vadd.f32 %v1203_v41, %v363_v38  ;;  %517 = vmatmul.bf16.gmra.mxu3 %v416_v37 }
 0x112   : > { %v377_v42 = vpack.c.bf16 %v364_v40, %v362_v39 }
 0x114   : > { %v391_v43 = vunpack.c.l.bf16 %v377_v42  ;;  %v392_v44 = vunpack.c.h.bf16 %v377_v42 }
 0x116   : > { %917 = vtanh.f32 %v391_v43 }
 0x117   : > { %919 = vtanh.f32 %v392_v44  ;;  %v366_v45 = vpop.f32.mrf.mxu0 }
 0x118   : > { %v367_v50 = vadd.f32 %v1203_v41, %v366_v45 }
 0x11c   : > { %v918_v46 = vpop.eup %917 }
 0x11d   : > { %v920_v47 = vpop.eup %919 }
 0x11e   : > { %v417_v48 = vpack.c.bf16 %v920_v47, %v918_v46 }
 0x11f   : > { %v368_v49 = vpop.f32.mrf.mxu0 }
 0x120   : > { %v369_v51 = vadd.f32 %v1203_v41, %v368_v49  ;;  %522 = vmatmul.bf16.gmra.mxu3 %v417_v48 }
 0x122   : > { %v378_v52 = vpack.c.bf16 %v369_v51, %v367_v50 }
 0x124   : > { %v393_v53 = vunpack.c.l.bf16 %v378_v52  ;;  %v394_v54 = vunpack.c.h.bf16 %v378_v52 }
 0x126   : > { %921 = vtanh.f32 %v393_v53 }
 0x127   : > { %923 = vtanh.f32 %v394_v54 }
 0x12c   : > { %v922_v55 = vpop.eup %921 }
 0x12d   : > { %v924_v56 = vpop.eup %923 }
 0x12e   : > { %v418_v57 = vpack.c.bf16 %v924_v56, %v922_v55 }
 0x130   : > { %527 = vmatmul.bf16.gmra.mxu3 %v418_v57 }
 0x13d   : > { %v493_v58 = vpop.f32.mrf.mxu1 }
 0x13e   : > { %v494_v61 = vadd.f32 %v1244_v59, %v493_v58 }
 0x145   : > { %v495_v60 = vpop.f32.mrf.mxu1 }
 0x146   : > { %v496_v41 = vadd.f32 %v1244_v59, %v495_v60 }
 0x148   : > { %v1248_v62 = vpack.c.bf16 %v496_v41, %v494_v61 }
 0x14d   : > { %v1252_v6 = vpop.f32.mrf.mxu1 }
 0x14e   : > { %v499_v58 = vadd.f32 %v1244_v59, %v1252_v6  ;;  %v541_v6 = vunpack.c.l.bf16 %v1248_v62 }
 0x155   : > { %v500_v10 = vpop.f32.mrf.mxu1 }
 0x156   : > { %v501_v54 = vadd.f32 %v1244_v59, %v500_v10 }
 0x158   : > { %v534_v61 = vpack.c.bf16 %v501_v54, %v499_v58 }
 0x15d   : > { %v503_v13 = vpop.f32.mrf.mxu1 }
 0x15e   : > { %v504_v50 = vadd.f32 %v1244_v59, %v503_v13 }
 0x165   : > { %v505_v17 = vpop.f32.mrf.mxu1 }
 0x166   : > { %v506_v46 = vadd.f32 %v1244_v59, %v505_v17 }
 0x168   : > { %v535_v52 = vpack.c.bf16 %v506_v46, %v504_v50 }
 0x16a   : > { %v545_v55 = vunpack.c.l.bf16 %v535_v52  ;;  %v546_v56 = vunpack.c.h.bf16 %v535_v52 }
 0x16d   : > { %v508_v26 = vpop.f32.mrf.mxu1 }
 0x16e   : > { %v509_v42 = vadd.f32 %v1244_v59, %v508_v26 }
 0x175   : > { %v510_v35 = vpop.f32.mrf.mxu1 }
 0x176   : > { %v511_v37 = vadd.f32 %v1244_v59, %v510_v35 }
 0x178   : > { %v536_v44 = vpack.c.bf16 %v511_v37, %v509_v42 }
 0x17a   : > { %v547_v47 = vunpack.c.l.bf16 %v536_v44  ;;  %v548_v48 = vunpack.c.h.bf16 %v536_v44 }
 0x183   : > { %v513_v63 = vpop.f32.mrf.mxu3 }
 0x184   : > { %v514_v1 = vadd.f32 %v1244_v59, %v513_v63  ;;  %v600_v63 = vld [vmem:[%s1315_s4] sm:$0x1] }
 0x185   : > { %826 = vmatmul.msk.f32.vlgmr.msrb.gmra.mxu3 %vm293_vm1, %v600_v63 }
 0x18b   : > { %v515_v0 = vpop.f32.mrf.mxu3 }
 0x18c   : > { %v516_v2 = vadd.f32 %v1244_v59, %v515_v0  ;;  %v244_v0 = vld [vmem:[%s1314_s3 + $0x3] sm:$0x1] }
 0x18e   : > { %v537_v3 = vpack.c.bf16 %v516_v2, %v514_v1  ;;  %v543_v1 = vunpack.c.l.bf16 %v534_v61  ;;  %v544_v2 = vunpack.c.h.bf16 %v534_v61 }
 0x190   : > { %v549_v38 = vunpack.c.l.bf16 %v537_v3  ;;  %v550_v39 = vunpack.c.h.bf16 %v537_v3  ;;  %v1021_v3 = vmov 0  }
 0x191   : > { %890 = vset.pattern.permute.xlu0 %v1021_v3 }
 0x192   : > { %584 = vperm.xlu0 %890, %v244_v0  }
 0x193   : > { %v518_v4 = vpop.f32.mrf.mxu3 }
 0x194   : > { %v519_v25 = vadd.f32 %v1244_v59, %v518_v4 }
 0x19b   : > { %v520_v5 = vpop.f32.mrf.mxu3 }
 0x19c   : > { %v521_v22 = vadd.f32 %v1244_v59, %v520_v5 }
 0x19e   : > { %v538_v28 = vpack.c.bf16 %v521_v22, %v519_v25 }
 0x1a0   : > { %v551_v31 = vunpack.c.l.bf16 %v538_v28  ;;  %v552_v32 = vunpack.c.h.bf16 %v538_v28 }
 0x1a3   : > { %v523_v7 = vpop.f32.mrf.mxu3 }
 0x1a4   : > { %v524_v18 = vadd.f32 %v1244_v59, %v523_v7  ;;  %v542_v7 = vunpack.c.h.bf16 %v1248_v62 }
 0x1ab   : > { %v525_v12 = vpop.f32.mrf.mxu3 }
 0x1ac   : > { %v526_v15 = vadd.f32 %v1244_v59, %v525_v12 }
 0x1ae   : > { %v539_v8 = vpack.c.bf16 %v526_v15, %v524_v18 }
 0x1b0   : > { %v553_v23 = vunpack.c.l.bf16 %v539_v8  ;;  %v554_v24 = vunpack.c.h.bf16 %v539_v8 }
 0x1b3   : > { %v528_v11 = vpop.f32.mrf.mxu3 }
 0x1b4   : > { %v529_v9 = vadd.f32 %v1244_v59, %v528_v11 }
 0x1bb   : > { %v530_v14 = vpop.f32.mrf.mxu3 }
 0x1bc   : > { %v531_v16 = vadd.f32 %v1244_v59, %v530_v14 }
 0x1be   : > { %v540_v19 = vpack.c.bf16 %v531_v16, %v529_v9  ;;  %v243_v9 = vld [vmem:[%s1314_s3 + $0x2] sm:$0x1] }
 0x1bf   : > { %v581_v16 = vpack.c.bf16 %v243_v9, %v243_v9 }
 0x1c0   : > { %v555_v20 = vunpack.c.l.bf16 %v540_v19  ;;  %v556_v21 = vunpack.c.h.bf16 %v540_v19 }
 0x1c2   : > { %925 = vtanh.f32 %v555_v20 }
 0x1c3   : > { %927 = vtanh.f32 %v556_v21 }
 0x1c4   : > { %929 = vtanh.f32 %v553_v23 }
 0x1c5   : > { %931 = vtanh.f32 %v554_v24 }
 0x1c6   : > { %933 = vtanh.f32 %v551_v31 }
 0x1c7   : > { %935 = vtanh.f32 %v552_v32 }
 0x1c8   : > { %v926_v27 = vpop.eup %925  ;;  %937 = vtanh.f32 %v549_v38 }
 0x1c9   : > { %v928_v29 = vpop.eup %927  ;;  %939 = vtanh.f32 %v550_v39 }
 0x1ca   : > { %v580_v30 = vpack.c.bf16 %v928_v29, %v926_v27  ;;  %v930_v33 = vpop.eup %929  ;;  %941 = vtanh.f32 %v547_v47 }
 0x1cb   : > { %v932_v34 = vpop.eup %931  ;;  %943 = vtanh.f32 %v548_v48 }
 0x1cc   : > { %587 = vmatpush.bf16.xpose.msra.mxu2 %v580_v30  ;;  %v579_v36 = vpack.c.bf16 %v932_v34, %v930_v33  ;;  %v934_v40 = vpop.eup %933  ;;  %945 = vtanh.f32 %v545_v55 }
 0x1cd   : > { %v936_v43 = vpop.eup %935  ;;  %947 = vtanh.f32 %v546_v56 }
 0x1ce   : > { %v578_v45 = vpack.c.bf16 %v936_v43, %v934_v40  ;;  %v938_v49 = vpop.eup %937  ;;  %949 = vtanh.f32 %v543_v1 }
 0x1cf   : > { %v940_v51 = vpop.eup %939  ;;  %951 = vtanh.f32 %v544_v2 }
 0x1d0   : > { %v577_v53 = vpack.c.bf16 %v940_v51, %v938_v49  ;;  %v942_v57 = vpop.eup %941  ;;  %953 = vtanh.f32 %v541_v6 }
 0x1d1   : > { %v944_v60 = vpop.eup %943  ;;  %955 = vtanh.f32 %v542_v7 }
 0x1d2   : > { %v576_v41 = vpack.c.bf16 %v944_v60, %v942_v57  ;;  %v946_v59 = vpop.eup %945 }
 0x1d3   : > { %v948_v4 = vpop.eup %947 }
 0x1d4   : > { %588 = vmatpush.bf16.xpose.msra.mxu2 %v579_v36  ;;  %v575_v5 = vpack.c.bf16 %v948_v4, %v946_v59  ;;  %v950_v10 = vpop.eup %949 }
 0x1d5   : > { %v952_v12 = vpop.eup %951 }
 0x1d6   : > { %v574_v13 = vpack.c.bf16 %v952_v12, %v950_v10  ;;  %v954_v11 = vpop.eup %953 }
 0x1d7   : > { %v956_v14 = vpop.eup %955 }
 0x1d8   : > { %v573_v15 = vpack.c.bf16 %v956_v14, %v954_v11 }
 0x1dc   : > { %589 = vmatpush.bf16.xpose.msra.mxu2 %v578_v45 }
 0x1e4   : > { %590 = vmatpush.bf16.xpose.msra.mxu2 %v577_v53 }
 0x1ec   : > { %591 = vmatpush.bf16.xpose.msra.mxu2 %v576_v41 }
 0x1f4   : > { %592 = vmatpush.bf16.xpose.msra.mxu2 %v575_v5 }
 0x1fc   : > { %593 = vmatpush.bf16.xpose.msra.mxu2 %v574_v13 }
 0x204   : > { %594 = vmatpush.bf16.xpose.msra.mxu2 %v573_v15  ;;  %v585_v17 = vpop.permute.xlu0 %584 }
 0x208   : > { %v669_v19 = vpop.f32.mrf.mxu3 }
 0x20b   : > { %595 = vmatmul.bf16.vlgmr.msra.gmra.mxu2 %v581_v16 }
 0x28e   : > { %v596_v62 = vpop.f32.mrf.mxu2 }
 0x28f   : > { %v597_v18 = vadd.f32 %v596_v62, %v585_v17 }
 0x291   : > { %v672_v8 = vadd.f32 0.5, %v597_v18 }
 0x293   : > { %v673_v20 = vmul.f32 %v672_v8, %v669_v19 }
 0x295   : > { %v674_v21 = vadd.f32 0.5, %v673_v20 }
 0x296   : > { %v598_v22 = vpop.f32.mrf.mxu2 }
 0x297   : > { %675 = vst [vmem:[%s217_s30] sm:$0x1] %v674_v21 }
 0x298   : > { %984 = shalt.err (!%p981_p3)
}
 0x299   : > { %850 = dma.vmem_to_hbm [thread:$0]  (%p1090_p5), %s688_s6, 16, %s690_s25, %s677_s7  }
 0x29a PF: > { %p856_p4 = scmp.ge.s32.totalorder %s1019_s21, 2  ;;  %s701_s14 = sand.u32 1, %s1007_s18  }
 0x29b   : > { %s702_s15 = scalar_lea.sflag [#allocation3], %s701_s14 }
 0x29c   : > { %p853_p7 = pnand %p856_p4, %p1094_p6 }
 0x29e   : > { %p854_p8 = pneg %p853_p7 }
 0x2a0   : > { %1002 = dma.done.wait (%p854_p8), %s702_s15, 16  }
 0x2a1   : > { %1004 = vsyncadd (%p854_p8), %s702_s15, 4294967280  ;;  %p15_p9 = scmp.ge.s32.totalorder %s1077_s24, 4   ;;  %s1319_s18 = smov %s1011_s19 }
 0x2a2   : > { %s1320_s19 = smov %s1015_s20  ;;  %s1321_s20 = smov %s1088_s27 }
 0x2a3   : > { %s1322_s21 = smov %s1077_s24  ;;  %17 = sbr.rel (!%p15_p9) target bundleno = 3 (0x3), region = 75 }
 0x2a8   :  { %707 = vsyncpa [#allocation3], 1 }
 0x2a9   :  { %709 = vsyncpa [#allocation3 + $0x1], 1 }

</bundles_post_ra>
